<compile_context>
chip_gen: v6e
topology: v6e:2x2x1
jax: 0.10.0
libtpu: 0.0.40
codegen_flags: <defaults>
</compile_context>

<pallas_src>
import math
import functools

import jax
import jax.numpy as jnp
from jax.experimental import pallas as pl
from jax.experimental.pallas import tpu as pltpu


# -----------------------------------------------------------------------------
# Pallas kernel
# -----------------------------------------------------------------------------
def _rmsnorm_kernel(eps, x_ref, w_ref, o_ref):
    # x_ref: (tm, D) block of rows, w_ref: (1, D) resident weight.
    x = x_ref[...].astype(jnp.float32)                  # x.float()
    ms = jnp.mean(x * x, axis=-1, keepdims=True)        # (tm, 1)
    rms = jnp.sqrt(ms)
    # eps OUTSIDE the sqrt (matches the reference code). Exact reciprocal:
    # approx=True (~2^-12 rel err) would blow the 1e-5 tolerance; kernel is
    # HBM-bound so the exact EUP reciprocal costs nothing extra.
    inv = pl.reciprocal(rms + eps)
    w = w_ref[...].astype(jnp.float32)
    # Single cast at the store: whole pipeline stays in f32 on the VPU.
    # TODO(synk): torch promotes (half/bf16 * f32 weight) -> f32 output; here
    # the output keeps x.dtype (matches the provided JAX reference).
    o_ref[...] = (x * inv * w).astype(o_ref.dtype)


# -----------------------------------------------------------------------------
# Tiling helpers
# -----------------------------------------------------------------------------
def _sublane(dtype) -> int:
    # Sublane packing: 8 rows for 4-byte dtypes, 16 for 2-byte, 32 for 1-byte.
    return max(8, 32 // jnp.dtype(dtype).itemsize)


def _vmem_capacity_bytes() -> int:
    try:
        return int(pltpu.get_tpu_info().vmem_capacity_bytes)
    except Exception:
        return 64 << 20  # conservative: v7x per-TensorCore VMEM


def _default_target_block_bytes() -> int:
    # ~1/16 of VMEM per block, clamped to the measured 2-8 MiB sweet spot.
    cap = _vmem_capacity_bytes()
    return int(min(8 << 20, max(2 << 20, cap // 16)))


def _pick_row_tile(N, D, dtype, target_block_bytes) -> int:
    itemsize = jnp.dtype(dtype).itemsize
    sub = _sublane(dtype)
    row_bytes = max(1, D * itemsize)

    tm = (target_block_bytes // row_bytes) // sub * sub
    tm = max(sub, tm)

    # Keep the grid >=8 blocks when N is large enough (>=2 for small N) so the
    # "parallel" axis has work to shard across v7x's 2 TensorCores; costless
    # on single-core v5e/v6e.
    if N >= 8 * sub:
        cap = max(sub, (N // 8) // sub * sub)
        tm = min(tm, cap)
    elif N >= 2 * sub:
        cap = max(sub, (N // 2) // sub * sub)
        tm = min(tm, cap)

    # Never larger than the problem; tm == N is the full-extent exemption.
    return min(tm, N)


# -----------------------------------------------------------------------------
# Wrapper
# -----------------------------------------------------------------------------
def rmsnorm_pallas(x, weight, eps=1e-6, target_block_bytes=None):
    """RMSNorm over the last axis of x. weight: (D,)."""
    orig_shape = x.shape
    D = orig_shape[-1]
    N = math.prod(orig_shape[:-1])

    x2 = x.reshape(N, D)
    w2 = weight.reshape(1, D)

    if target_block_bytes is None:
        target_block_bytes = _default_target_block_bytes()

    tm = _pick_row_tile(N, D, x.dtype, target_block_bytes)
    grid = (pl.cdiv(N, tm),)

    in_item = jnp.dtype(x.dtype).itemsize
    out_item = in_item
    w_item = jnp.dtype(weight.dtype).itemsize

    # Explicit VMEM budget for the chosen tile: 2x in + 2x out (double
    # buffering) + ~2 f32-sized upcast temporaries + weight + headroom.
    block_bytes = tm * D * in_item
    f32_tmp = tm * D * 4
    vmem_limit = 2 * block_bytes + 2 * (tm * D * out_item) + 2 * f32_tmp
    vmem_limit += D * w_item + (2 << 20)
    vmem_limit = int(min(max(vmem_limit, 16 << 20), _vmem_capacity_bytes()))

    cost = pl.CostEstimate(
        flops=3 * N * D,                                    # square, reduce, scale*weight
        transcendentals=2 * N,                              # sqrt + reciprocal per row
        bytes_accessed=N * D * (in_item + out_item) + D * w_item,
    )

    # NOTE: D that is not a multiple of 128 (e.g. the tiny dim=32 smoke test)
    # uses the full-extent block exemption; production dims should be 128-
    # aligned for unmasked lane-dense stores.
    out = pl.pallas_call(
        functools.partial(_rmsnorm_kernel, eps),
        out_shape=jax.ShapeDtypeStruct((N, D), x.dtype),
        grid=grid,
        in_specs=[
            pl.BlockSpec((tm, D), lambda i: (i, 0)),   # rows of x
            pl.BlockSpec((1, D), lambda i: (0, 0)),    # weight, resident
        ],
        out_specs=pl.BlockSpec((tm, D), lambda i: (i, 0)),
        compiler_params=pltpu.CompilerParams(
            dimension_semantics=("parallel",),
            vmem_limit_bytes=vmem_limit,
        ),
        cost_estimate=cost,
    )(x2, w2)
    return out.reshape(orig_shape)


# -----------------------------------------------------------------------------
# Pure-JAX reference (mirror of the PyTorch module) for verification
# -----------------------------------------------------------------------------
def rmsnorm_ref(x, weight, eps=1e-6):
    xf = x.astype(jnp.float32)
    rms = jnp.sqrt(jnp.mean(xf * xf, axis=-1, keepdims=True))
    normed = (xf / (rms + eps)).astype(x.dtype)
    return normed * weight.astype(x.dtype)


# -----------------------------------------------------------------------------
# Main
# -----------------------------------------------------------------------------
if __name__ == "__main__":
    key = jax.random.PRNGKey(0)
    kx, kw, kx2, kw2, kx3, kw3 = jax.random.split(key, 6)

    # 1) Small shapes consistent with the module: (batch, seq, dim).
    batch, seqlen, dim = 2, 8, 32
    x = jax.random.normal(kx, (batch, seqlen, dim), dtype=jnp.float32)
    weight = 1.0 + 0.1 * jax.random.normal(kw, (dim,), dtype=jnp.float32)

    out = rmsnorm_pallas(x, weight)
    jax.block_until_ready(out)
    assert out.shape == x.shape
    assert jnp.all(jnp.isfinite(out))
    ref = rmsnorm_ref(x, weight)
    assert jnp.allclose(out, ref, rtol=1e-5, atol=1e-5), "mismatch vs reference (small)"

    # 2) Multi-block tiled path (N=128 rows -> >=8 blocks via the v7x cap).
    x2 = jax.random.normal(kx2, (2, 64, 256), dtype=jnp.float32)
    w2 = 1.0 + 0.1 * jax.random.normal(kw2, (256,), dtype=jnp.float32)
    out2 = rmsnorm_pallas(x2, w2)
    jax.block_until_ready(out2)
    ref2 = rmsnorm_ref(x2, w2)
    assert jnp.allclose(out2, ref2, rtol=1e-5, atol=1e-5), "mismatch vs reference (tiled)"

    # 3) bf16 input path (16-row sublane packing, f32 math, one final cast).
    x3 = jax.random.normal(kx3, (4, 32, 512), dtype=jnp.float32).astype(jnp.bfloat16)
    w3 = (1.0 + 0.1 * jax.random.normal(kw3, (512,), dtype=jnp.float32))
    out3 = rmsnorm_pallas(x3, w3)
    jax.block_until_ready(out3)
    xf3 = x3.astype(jnp.float32)
    rms3 = jnp.sqrt(jnp.mean(xf3 * xf3, axis=-1, keepdims=True))
    ref3 = ((xf3 / (rms3 + 1e-6)) * w3).astype(jnp.bfloat16)
    assert jnp.allclose(out3.astype(jnp.float32), ref3.astype(jnp.float32),
                        rtol=2e-2, atol=2e-2), "mismatch vs reference (bf16)"

    print("KERNEL_OK")
</pallas_src>

<mosaic_0001>
module attributes {stable_mosaic.version = 11 : i64} {
  func.func @_rmsnorm_kernel(%arg0: i32, %arg1: memref<8x32xf32, #tpu.memory_space<vmem>>, %arg2: memref<1x32xf32, #tpu.memory_space<vmem>>, %arg3: memref<8x32xf32, #tpu.memory_space<vmem>>) attributes {dimension_semantics = [#tpu.dimension_semantics<parallel>], iteration_bounds = array<i64: 2>, scalar_prefetch = 0 : i64, scratch_operands = 0 : i64, tpu.core_type = #tpu.core_type<tc>, window_params = [{transform_indices = @transform_0, window_bounds = array<i64: 8, 32>}, {pipeline_mode = #tpu.pipeline_mode<synchronous>, transform_indices = @transform_1, window_bounds = array<i64: 1, 32>}, {transform_indices = @transform_2, window_bounds = array<i64: 8, 32>}]} {
    %c0 = arith.constant 0 : index
    %c0_0 = arith.constant 0 : index
    %0 = vector.load %arg1[%c0, %c0_0] : memref<8x32xf32, #tpu.memory_space<vmem>>, vector<8x32xf32>
    %1 = arith.mulf %0, %0 : vector<8x32xf32>
    %cst = arith.constant dense<0.000000e+00> : vector<8xf32>
    %2 = vector.multi_reduction <add>, %1, %cst [1] : vector<8x32xf32> to vector<8xf32>
    %3 = vector.shape_cast %2 : vector<8xf32> to vector<8x1xf32>
    %cst_1 = arith.constant 3.200000e+01 : f32
    %4 = vector.broadcast %cst_1 : f32 to vector<8x1xf32>
    %5 = arith.divf %3, %4 : vector<8x1xf32>
    %6 = math.sqrt %5 : vector<8x1xf32>
    %cst_2 = arith.constant 9.99999997E-7 : f32
    %7 = vector.broadcast %cst_2 : f32 to vector<8x1xf32>
    %8 = arith.addf %6, %7 : vector<8x1xf32>
    %9 = tpu.reciprocal %8 : vector<8x1xf32> -> vector<8x1xf32>
    %c0_3 = arith.constant 0 : index
    %c0_4 = arith.constant 0 : index
    %10 = vector.load %arg2[%c0_3, %c0_4] : memref<1x32xf32, #tpu.memory_space<vmem>>, vector<1x32xf32>
    %11 = vector.broadcast %9 : vector<8x1xf32> to vector<8x32xf32>
    %12 = arith.mulf %0, %11 : vector<8x32xf32>
    %13 = vector.broadcast %10 : vector<1x32xf32> to vector<8x32xf32>
    %14 = arith.mulf %12, %13 : vector<8x32xf32>
    %c0_5 = arith.constant 0 : index
    %c0_6 = arith.constant 0 : index
    %15 = vector.load %arg3[%c0_5, %c0_6] : memref<8x32xf32, #tpu.memory_space<vmem>>, vector<8x32xf32>
    tpu.vector_store %arg3[%c0_5, %c0_6], %14 {strides = array<i32>} : memref<8x32xf32, #tpu.memory_space<vmem>>, vector<8x32xf32>,
    return
  }
  func.func @transform_0(%arg0: i32) -> (i32, i32) {
    %c0_i32 = arith.constant 0 : i32
    %c0_i32_0 = arith.constant 0 : i32
    return %arg0, %c0_i32 : i32, i32
  }
  func.func @transform_1(%arg0: i32) -> (i32, i32) {
    %c0_i32 = arith.constant 0 : i32
    %c0_i32_0 = arith.constant 0 : i32
    %c0_i32_1 = arith.constant 0 : i32
    return %c0_i32, %c0_i32_0 : i32, i32
  }
  func.func @transform_2(%arg0: i32) -> (i32, i32) {
    %c0_i32 = arith.constant 0 : i32
    %c0_i32_0 = arith.constant 0 : i32
    return %arg0, %c0_i32 : i32, i32
  }
}

</mosaic_0001>

<bundles_post_ra>
// kernel: tpu_custom_call.1
= control target key start
LH: loop header
LB: loop body
LE: loop exit
PB: predicated region body
PF: predicated region fallthrough
CT: control target
= control target key end

     0   :  { %7 = vsyncpa [#allocation3], 0  ;;  %s590_s0 = inlined_call_operand.hbm [shape: f32[16,32], index: 0, kind: input, shape index: {}]   ;;  %s591_s1 = inlined_call_operand.vmem [shape: f32[1,32], index: 1, kind: input, shape index: {}]   ;;  %s592_s2 = inlined_call_operand.hbm [shape: f32[16,32], index: 2, kind: output, shape index: {}]  }
   0x1   :  { %9 = vsyncpa [#allocation3 + $0x1], 0 }
   0x2   :  { %10 = vsyncpa [#allocation4], 0 }
   0x3   :  { %12 = vsyncpa [#allocation4 + $0x1], 0  ;;  %s444_s9 = smov 0   ;;  %s446_s10 = smov 0  }
   0x4   :  { %s448_s11 = smov 0   ;;  %s450_s12 = smov 0  }
   0x5 LB: > { %s465_s13 = sadd.s32 4294967295, %s425_s12   ;;  %s270_s14 = sadd.s32 4294967294, %s425_s12   ;;  %s425_s12 = sphi %s450_s12, %s609_s12   ;;  %s421_s11 = sphi %s448_s11, %s608_s11   ;;  %s417_s10 = sphi %s446_s10, %s607_s10   ;;  %s413_s9 = sphi %s444_s9, %s606_s9  }
   0x6   : > { %s469_s15 = sadd.s32 1, %s425_s12   ;;  %s25_s16 = sadd.s32 1, %s421_s11 }
   0x7   : > { %s22_s17 = ssub.s32 %s425_s12, %s469_s15  ;;  %p32_p0 = scmp.ne.s32.totalorder %s421_s11, %s417_s10 }
   0x8   : > { %p23_p1 = scmp.eq.s32.totalorder %s22_s17, 0  ;;  %p33_p2 = scmp.eq.s32.totalorder %s425_s12, 0 }
   0x9   : > { %p38_p3 = scmp.ne.s32.totalorder %s417_s10, %s413_s9  ;;  %p39_p4 = scmp.eq.s32.totalorder %s465_s13, 0 }
   0xa   : > { %s481_s18 = scalar_select %p23_p1, %s421_s11, %s25_s16  }
   0xb   : > { %p483_p5 = por %p33_p2, %p32_p0  ;;  %p487_p6 = por %p39_p4, %p38_p3 }
   0xc   : > { %p83_p7 = scmp.eq.s32.totalorder %s465_s13, 1  ;;  %p89_p8 = scmp.eq.s32.totalorder %s270_s14, 1 }
   0xd   : > { %s596_s20 = scalar_select %p487_p6, 1, 0 }
   0xe   : > { %p295_p10 = scmp.lt.s32.totalorder %s425_s12, 2  ;;  %p494_p11 = por %p83_p7, %p32_p0 }
   0xf   : > { %p498_p12 = por %p89_p8, %p38_p3  ;;  %s112_s23 = sand.u32 1, %s421_s11  }
  0x10   : > { %s597_s21 = scalar_select %p494_p11, 1, 0 }
  0x11   : > { %s598_s22 = scalar_select %p498_p12, 1, 0 }
  0x12   : > { %s274_s24 = sshll.u32 %s425_s12, 7  ;;  %s273_s25 = sshll.u32 %s112_s23, 3 }
  0x13   : > { %s507_s28 = scalar_lea.hbm %s590_s0, %s274_s24  ;;  %s116_s29 = scalar_lea.vmem [#allocation2], %s273_s25 }
  0x14   : > { %s123_s30 = sshll.u32 %s116_s29, 4  ;;  %p511_p13 = pnand %p295_p10, %p483_p5  ;;  %s515_s30 = int_to_ptr.vmem [resolvable:$true] %s123_s30 }
  0x15   : > { %s113_s4 = scalar_lea.sflag [#allocation3], %s112_s23  ;;  %s333_s5 = scalar_lea.hbm %s507_s28, 128 }
  0x16   : > { %p334_p2 = scmp.ne.s32.totalorder %s507_s28, %s333_s5  ;;  %p335_p3 = pneg %p511_p13 }
  0x17   : > { %s338_s8 = scalar_lea.hbm %s590_s0, 256  ;;  %p339_p5 = scmp.lt.s32.totalorder %s507_s28, %s590_s0 }
  0x18   : > { %p336_p4 = pnand %p335_p3, %p334_p2  ;;  %p340_p8 = scmp.lt.s32.totalorder %s338_s8, %s333_s5 }
  0x1a   : > { %p337_p7 = pneg %p336_p4  ;;  %p341_p10 = por %p340_p8, %p339_p5 }
  0x1c   : > { %p342_p9 = pnand %p341_p10, %p337_p7 }
  0x1e   : > { %345 = shalt.err (!%p342_p9)
}
  0x1f   : > { %s346_s17 = scalar_lea.vmem %s515_s30, 128  ;;  %s427_s19 = smov [#allocation2]  }
  0x20   : > { %p347_p0 = scmp.ne.s32.totalorder %s515_s30, %s346_s17  ;;  %s351_s23 = sshll.u32 %s427_s19, 4  ;;  %s352_s23 = int_to_ptr.vmem [resolvable:$false] %s351_s23 }
  0x21   : > { %s353_s24 = scalar_lea.vmem %s352_s23, 256  ;;  %p354_p4 = scmp.lt.s32.totalorder %s515_s30, %s352_s23 }
  0x22   : > { %p349_p1 = pnand %p347_p0, %p335_p3  ;;  %p355_p12 = scmp.lt.s32.totalorder %s353_s24, %s346_s17 }
  0x24   : > { %p350_p2 = pneg %p349_p1  ;;  %p356_p11 = por %p355_p12, %p354_p4 }
  0x26   : > { %p357_p6 = pnand %p356_p11, %p350_p2 }
  0x28   : > { %360 = shalt.err (!%p357_p6)
}
  0x29   : > { %290 = dma.hbm_to_vmem [thread:$0]  (!%p511_p13), %s507_s28, 128, %s515_s30, %s113_s4  }
  0x2a   : > { %p600_p9 = scmp.lt.s32.totalorder %s425_s12, 3  ;;  %p601_p7 = scmp.ge.s32.totalorder %s425_s12, 1 }
  0x2c   : > { %p129_p0 = pnand %p601_p7, %p600_p9 }
  0x2d   : > { %s542_s25 = sand.u32 (!%p129_p0), 1, %s417_s10   ;;  %p602_p6 = scmp.ne.s32.totalorder (!%p129_p0), %s596_s20, 0 }
  0x2e   : > { %132 = sbr.rel (%p129_p0) target bundleno = 247 (0xf7), region = 28  ;;  %s276_s26 = sshll.u32 (!%p129_p0), %s542_s25, 3 }
  0x2f   : > { %s135_s27 = scalar_lea.sflag (!%p129_p0), [#allocation3], %s542_s25  ;;  %s138_s29 = scalar_lea.vmem (!%p129_p0), [#allocation2], %s276_s26 }
  0x33   : > { %404 = dma.done.wait (%p602_p6), %s135_s27, 128  }
  0x34   : > { %406 = vsyncadd (%p602_p6), %s135_s27, 4294967168  ;;  %v159_v0 = vld [vmem:[%s138_s29] sm:$0xff]  ;;  %vm161_vm0 = vcmask 261120   ;;  %s280_s30 = sshll.u32 %s465_s13, 7  ;;  %s158_s3 = scalar_lea.vmem [#allocation5], %s276_s26 }
  0x35   : > { %v160_v1 = vmul.f32 %v159_v0, %v159_v0  ;;  %v278_v12 = vld [vmem:[%s591_s1] ss:$0 sm:$0xff]  ;;  %s200_s4 = sshll.u32 %s158_s3, 4  ;;  %s198_s7 = scalar_lea.hbm %s592_s2, %s280_s30  ;;  %s201_s4 = int_to_ptr.vmem [resolvable:$true] %s200_s4 }
  0x36   : > { %s187_s8 = scalar_lea.sflag [#allocation4], %s542_s25  ;;  %s361_s14 = scalar_lea.vmem %s201_s4, 128 }
  0x37   : > { %v162_v2 = vsel %vm161_vm0, %v160_v1, 0.0  ;;  %p362_p11 = scmp.ne.s32.totalorder %s201_s4, %s361_s14  ;;  %p603_p12 = scmp.ne.s32.totalorder %s597_s21, 0 }
  0x38   : > { %163 = vadd.xlane.f32.xlu0 %v162_v2  ;;  %s428_s16 = smov [#allocation5]  }
  0x39   : > { %p363_p13 = pnand %p362_p11, %p603_p12  ;;  %s365_s17 = sshll.u32 %s428_s16, 4  ;;  %s366_s17 = int_to_ptr.vmem [resolvable:$false] %s365_s17 }
  0x3a   : > { %s367_s13 = scalar_lea.vmem %s366_s17, 256  ;;  %p368_p3 = scmp.lt.s32.totalorder %s201_s4, %s366_s17 }
  0x3b   : > { %p364_p1 = pneg %p363_p13  ;;  %p369_p5 = scmp.lt.s32.totalorder %s367_s13, %s361_s14 }
  0x3d   : > { %p370_p8 = por %p369_p5, %p368_p3 }
  0x3f   : > { %p371_p10 = pnand %p370_p8, %p364_p1 }
  0xc1   : > { %v164_v3 = vpop.xlane.xlu0 %163 }
  0xc2   : > { %v166_v4 = vmul.f32 0.03125, %v164_v3 }
  0xc4   : > { %329 = vrsqrt.f32 %v166_v4  ;;  %vm169_vm1 = vcmp.eq.f32.partialorder %v166_v4, inf  ;;  %v172_v7 = vand.u32 2147483648, %v166_v4  ;;  %vm171_vm2 = vcmp.eq.f32.partialorder %v166_v4, 0.0 }
  0xd1   : > { %v330_v5 = vpop.eup %329 }
  0xd2   : > { %v168_v6 = vmul.f32 %v330_v5, %v166_v4 }
  0xd4   : > { %v170_v8 = vsel %vm169_vm1, %v166_v4, %v168_v6 }
  0xd5   : > { %v173_v9 = vsel %vm171_vm2, %v172_v7, %v170_v8 }
  0xd6   : > { %v174_v10 = vadd.f32 1e-06, %v173_v9 }
  0xd8   : > { %331 = vrcp.f32 %v174_v10 }
  0xe5   : > { %v332_v11 = vpop.eup %331 }
  0xe6   : > { %v177_v13 = vmul.f32 %v332_v11, %v159_v0 }
  0xe8   : > { %v184_v14 = vmul.f32 %v278_v12, %v177_v13 }
  0xea   : > { %185 = vst.msk [vmem:[%s158_s3] sm:$0xff] %vm161_vm0, %v184_v14 }
  0xeb   : > { %374 = shalt.err (!%p371_p10)
}
  0xec   : > { %s375_s19 = scalar_lea.hbm %s198_s7, 128  ;;  %s379_s25 = scalar_lea.hbm %s592_s2, 256 }
  0xed   : > { %p376_p2 = scmp.ne.s32.totalorder %s198_s7, %s375_s19  ;;  %p380_p7 = scmp.lt.s32.totalorder %s198_s7, %s592_s2 }
  0xee   : > { %p381_p0 = scmp.lt.s32.totalorder %s379_s25, %s375_s19 }
  0xef   : > { %p377_p4 = pnand %p376_p2, %p603_p12 }
  0xf0   : > { %p382_p6 = por %p381_p0, %p380_p7 }
  0xf1   : > { %p378_p9 = pneg %p377_p4 }
  0xf3   : > { %p383_p11 = pnand %p382_p6, %p378_p9 }
  0xf5   : > { %386 = shalt.err (!%p383_p11)
}
  0xf6   : > { %285 = dma.vmem_to_hbm [thread:$0]  (%p603_p12), %s201_s4, 128, %s198_s7, %s187_s8  }
  0xf7 PF: > { %s212_s29 = sand.u32 1, %s413_s9   ;;  %p604_p13 = scmp.ne.s32.totalorder %s598_s22, 0 }
  0xf8   : > { %p605_p1 = scmp.ge.s32.totalorder %s425_s12, 2  ;;  %s213_s20 = scalar_lea.sflag [#allocation4], %s212_s29 }
  0xfa   : > { %p292_p3 = pnand %p605_p1, %p604_p13 }
  0xfc   : > { %p293_p5 = pneg %p292_p3 }
  0xfe   : > { %408 = dma.done.wait (%p293_p5), %s213_s20, 128  }
  0xff   : > { %410 = vsyncadd (%p293_p5), %s213_s20, 4294967168  ;;  %p15_p8 = scmp.ge.s32.totalorder %s469_s15, 4   ;;  %s606_s9 = smov %s417_s10 }
 0x100   : > { %s607_s10 = smov %s421_s11  ;;  %s608_s11 = smov %s481_s18 }
 0x101   : > { %s609_s12 = smov %s469_s15  ;;  %17 = sbr.rel (!%p15_p8) target bundleno = 5 (0x5), region = 73 }
 0x106   :  { %218 = vsyncpa [#allocation3], 1 }
 0x107   :  { %220 = vsyncpa [#allocation3 + $0x1], 1 }
 0x108   :  { %221 = vsyncpa [#allocation4], 1 }
 0x109   :  { %223 = vsyncpa [#allocation4 + $0x1], 1 }

</bundles_post_ra>
